<compile_context>
chip_gen: v7x
topology: tpu7x:2x2x1
jax: 0.10.0
libtpu: 0.0.40
codegen_flags: <defaults>
</compile_context>

<pallas_src>
import functools

import jax
import jax.numpy as jnp
from jax.experimental import pallas as pl
from jax.experimental.pallas import tpu as pltpu


def _ln_channels_kernel(x_ref, gamma_ref, beta_ref, o_ref, *, eps):
    # x_ref/o_ref: (1, C, TL) ; gamma_ref/beta_ref: (1, C, 1)
    x = x_ref[...].astype(jnp.float32)
    # Reduce over the channel (sublane) axis; every lane column is independent.
    mean = jnp.mean(x, axis=1, keepdims=True)            # (1, 1, TL)
    xc = x - mean
    var = jnp.mean(xc * xc, axis=1, keepdims=True)       # biased, like PyTorch
    inv = jax.lax.rsqrt(var + eps)                       # (1, 1, TL)
    g = gamma_ref[...].astype(jnp.float32)               # (1, C, 1)
    b = beta_ref[...].astype(jnp.float32)                # (1, C, 1)
    y = xc * (inv * g) + b                               # broadcast over lanes/sublanes
    o_ref[...] = y.astype(o_ref.dtype)


def _pick_tile_lanes(L, C, itemsize, target_block_bytes):
    """Largest lane tile (multiple of 128, or the full extent) near the target."""
    if C * L * itemsize <= target_block_bytes or L < 128:
        return L                                          # whole spatial extent in one block
    tl = max(128, (target_block_bytes // (C * itemsize)) // 128 * 128)
    return int(min(tl, (L // 128) * 128))


def layernorm_channels(x, gamma, beta, *, eps=1e-5, tile_lanes=None):
    """x: (N, C, H, W); gamma, beta: (C,).  Returns LayerNorm-over-C, shape (N, C, H, W)."""
    N, C, H, W = x.shape
    L = H * W
    # Free layout changes only (no data movement): collapse spatial dims.
    x3 = x.reshape(N, C, L)
    g3 = gamma.reshape(1, C, 1)
    b3 = beta.reshape(1, C, 1)

    itemsize = jnp.dtype(x.dtype).itemsize

    # Per-chip VMEM budget: keep double-buffered in+out blocks well inside the
    # scoped limit (v7x has only 64 MiB physical; v5e/v6e have 128 MiB).
    try:
        vmem_cap = int(pltpu.get_tpu_info().vmem_capacity_bytes)
    except Exception:  # pragma: no cover - conservative fallback
        vmem_cap = 64 * 1024 * 1024
    vmem_limit = int(min(vmem_cap // 2, 64 * 1024 * 1024))
    target_block_bytes = min(4 * 1024 * 1024, vmem_limit // 8)

    tl = tile_lanes if tile_lanes is not None else _pick_tile_lanes(
        L, C, itemsize, target_block_bytes)

    # Grid: (batch, spatial blocks).  Both axes fully parallel (output blocks
    # are disjoint), so v7x's two TensorCores can both drive HBM.
    grid = (N, pl.cdiv(L, tl))

    out3 = pl.pallas_call(
        functools.partial(_ln_channels_kernel, eps=eps),
        out_shape=jax.ShapeDtypeStruct((N, C, L), x.dtype),
        grid_spec=pltpu.PrefetchScalarGridSpec(
            num_scalar_prefetch=0,
            grid=grid,
            in_specs=[
                pl.BlockSpec((1, C, tl), lambda n, l: (n, 0, l)),
                pl.BlockSpec((1, C, 1), lambda n, l: (0, 0, 0)),
                pl.BlockSpec((1, C, 1), lambda n, l: (0, 0, 0)),
            ],
            out_specs=pl.BlockSpec((1, C, tl), lambda n, l: (n, 0, l)),
        ),
        compiler_params=pltpu.CompilerParams(
            dimension_semantics=("parallel", "parallel"),
            vmem_limit_bytes=vmem_limit,
        ),
    )(x3, g3, b3)

    return out3.reshape(N, C, H, W)


def _reference(x, gamma, beta, eps=1e-5):
    # Plain-JAX reference mirroring the PyTorch module applied over channels.
    x_nhwc = jnp.transpose(x, (0, 2, 3, 1)).astype(jnp.float32)
    mean = jnp.mean(x_nhwc, axis=-1, keepdims=True)
    var = jnp.mean((x_nhwc - mean) ** 2, axis=-1, keepdims=True)
    y = (x_nhwc - mean) / jnp.sqrt(var + eps)
    y = y * gamma + beta
    return jnp.transpose(y, (0, 3, 1, 2)).astype(x.dtype)


if __name__ == "__main__":
    key = jax.random.PRNGKey(0)
    N, C, H, W = 2, 4, 16, 16
    kx, kg, kb = jax.random.split(key, 3)
    x = jax.random.normal(kx, (N, C, H, W), dtype=jnp.float32)
    # nn.LayerNorm init is weight=1 / bias=0 — perturb deterministically so the
    # affine path is exercised.
    gamma = jnp.ones((C,), jnp.float32) + 0.1 * jax.random.normal(kg, (C,), jnp.float32)
    beta = jnp.zeros((C,), jnp.float32) + 0.1 * jax.random.normal(kb, (C,), jnp.float32)

    out = jax.block_until_ready(layernorm_channels(x, gamma, beta))
    ref = _reference(x, gamma, beta)
    assert out.shape == (N, C, H, W)
    assert jnp.allclose(out, ref, atol=1e-5, rtol=1e-5), "mismatch vs reference"

    # Exercise the multi-block lane-tiled path (several spatial blocks per image).
    x2 = jax.random.normal(jax.random.PRNGKey(1), (2, 4, 32, 32), dtype=jnp.float32)
    out2 = jax.block_until_ready(layernorm_channels(x2, gamma, beta, tile_lanes=256))
    ref2 = _reference(x2, gamma, beta)
    assert jnp.allclose(out2, ref2, atol=1e-5, rtol=1e-5), "mismatch vs reference (tiled)"

    print("KERNEL_OK")
</pallas_src>

<mosaic_0001>
module attributes {stable_mosaic.version = 11 : i64} {
  func.func @_ln_channels_kernel(%arg0: i32, %arg1: i32, %arg2: memref<1x4x256xf32, #tpu.memory_space<vmem>>, %arg3: memref<1x4x1xf32, #tpu.memory_space<vmem>>, %arg4: memref<1x4x1xf32, #tpu.memory_space<vmem>>, %arg5: memref<1x4x256xf32, #tpu.memory_space<vmem>>) attributes {dimension_semantics = [#tpu.dimension_semantics<parallel>, #tpu.dimension_semantics<parallel>], iteration_bounds = array<i64: 2, 1>, scalar_prefetch = 0 : i64, scratch_operands = 0 : i64, tpu.core_type = #tpu.core_type<tc>, window_params = [{transform_indices = @transform_0, window_bounds = array<i64: 1, 4, 256>}, {pipeline_mode = #tpu.pipeline_mode<synchronous>, transform_indices = @transform_1, window_bounds = array<i64: 1, 4, 1>}, {pipeline_mode = #tpu.pipeline_mode<synchronous>, transform_indices = @transform_2, window_bounds = array<i64: 1, 4, 1>}, {transform_indices = @transform_3, window_bounds = array<i64: 1, 4, 256>}]} {
    %c0 = arith.constant 0 : index
    %c0_0 = arith.constant 0 : index
    %c0_1 = arith.constant 0 : index
    %0 = vector.load %arg2[%c0, %c0_0, %c0_1] : memref<1x4x256xf32, #tpu.memory_space<vmem>>, vector<1x4x256xf32>
    %cst = arith.constant dense<0.000000e+00> : vector<1x256xf32>
    %1 = vector.multi_reduction <add>, %0, %cst [1] : vector<1x4x256xf32> to vector<1x256xf32>
    %2 = vector.shape_cast %1 : vector<1x256xf32> to vector<1x1x256xf32>
    %cst_2 = arith.constant 4.000000e+00 : f32
    %3 = vector.broadcast %cst_2 : f32 to vector<1x1x256xf32>
    %4 = arith.divf %2, %3 : vector<1x1x256xf32>
    %5 = vector.broadcast %4 : vector<1x1x256xf32> to vector<1x4x256xf32>
    %6 = arith.subf %0, %5 : vector<1x4x256xf32>
    %7 = arith.mulf %6, %6 : vector<1x4x256xf32>
    %cst_3 = arith.constant dense<0.000000e+00> : vector<1x256xf32>
    %8 = vector.multi_reduction <add>, %7, %cst_3 [1] : vector<1x4x256xf32> to vector<1x256xf32>
    %9 = vector.shape_cast %8 : vector<1x256xf32> to vector<1x1x256xf32>
    %cst_4 = arith.constant 4.000000e+00 : f32
    %10 = vector.broadcast %cst_4 : f32 to vector<1x1x256xf32>
    %11 = arith.divf %9, %10 : vector<1x1x256xf32>
    %cst_5 = arith.constant 9.99999974E-6 : f32
    %12 = vector.broadcast %cst_5 : f32 to vector<1x1x256xf32>
    %13 = arith.addf %11, %12 : vector<1x1x256xf32>
    %14 = math.rsqrt %13 : vector<1x1x256xf32>
    %c0_6 = arith.constant 0 : index
    %c0_7 = arith.constant 0 : index
    %c0_8 = arith.constant 0 : index
    %15 = vector.load %arg3[%c0_6, %c0_7, %c0_8] : memref<1x4x1xf32, #tpu.memory_space<vmem>>, vector<1x4x1xf32>
    %c0_9 = arith.constant 0 : index
    %c0_10 = arith.constant 0 : index
    %c0_11 = arith.constant 0 : index
    %16 = vector.load %arg4[%c0_9, %c0_10, %c0_11] : memref<1x4x1xf32, #tpu.memory_space<vmem>>, vector<1x4x1xf32>
    %17 = vector.broadcast %14 : vector<1x1x256xf32> to vector<1x4x256xf32>
    %18 = vector.broadcast %15 : vector<1x4x1xf32> to vector<1x4x256xf32>
    %19 = arith.mulf %17, %18 : vector<1x4x256xf32>
    %20 = arith.mulf %6, %19 : vector<1x4x256xf32>
    %21 = vector.broadcast %16 : vector<1x4x1xf32> to vector<1x4x256xf32>
    %22 = arith.addf %20, %21 : vector<1x4x256xf32>
    %c0_12 = arith.constant 0 : index
    %c0_13 = arith.constant 0 : index
    %c0_14 = arith.constant 0 : index
    %23 = vector.load %arg5[%c0_12, %c0_13, %c0_14] : memref<1x4x256xf32, #tpu.memory_space<vmem>>, vector<1x4x256xf32>
    tpu.vector_store %arg5[%c0_12, %c0_13, %c0_14], %22 {strides = array<i32>} : memref<1x4x256xf32, #tpu.memory_space<vmem>>, vector<1x4x256xf32>,
    return
  }
  func.func @transform_0(%arg0: i32, %arg1: i32) -> (i32, i32, i32) {
    %c0_i32 = arith.constant 0 : i32
    %c0_i32_0 = arith.constant 0 : i32
    return %arg0, %c0_i32, %arg1 : i32, i32, i32
  }
  func.func @transform_1(%arg0: i32, %arg1: i32) -> (i32, i32, i32) {
    %c0_i32 = arith.constant 0 : i32
    %c0_i32_0 = arith.constant 0 : i32
    %c0_i32_1 = arith.constant 0 : i32
    %c0_i32_2 = arith.constant 0 : i32
    return %c0_i32, %c0_i32_0, %c0_i32_1 : i32, i32, i32
  }
  func.func @transform_2(%arg0: i32, %arg1: i32) -> (i32, i32, i32) {
    %c0_i32 = arith.constant 0 : i32
    %c0_i32_0 = arith.constant 0 : i32
    %c0_i32_1 = arith.constant 0 : i32
    %c0_i32_2 = arith.constant 0 : i32
    return %c0_i32, %c0_i32_0, %c0_i32_1 : i32, i32, i32
  }
  func.func @transform_3(%arg0: i32, %arg1: i32) -> (i32, i32, i32) {
    %c0_i32 = arith.constant 0 : i32
    %c0_i32_0 = arith.constant 0 : i32
    return %arg0, %c0_i32, %arg1 : i32, i32, i32
  }
}

</mosaic_0001>

<bundles_post_ra>
// kernel: tpu_custom_call.1
= control target key start
LH: loop header
LB: loop body
LE: loop exit
PB: predicated region body
PF: predicated region fallthrough
CT: control target
= control target key end

     0   :  { %8 = vsyncpa [#allocation3], 0  ;;  %s798_s0 = inlined_call_operand.hbm [shape: f32[2,4,256], index: 0, kind: input, shape index: {}]   ;;  %s799_s1 = inlined_call_operand.vmem [shape: f32[1,4,1], index: 1, kind: input, shape index: {}]   ;;  %s800_s2 = inlined_call_operand.vmem [shape: f32[1,4,1], index: 2, kind: input, shape index: {}]   ;;  %s801_s3 = inlined_call_operand.hbm [shape: f32[2,4,256], index: 3, kind: output, shape index: {}]  }
   0x1   :  { %10 = vsyncpa [#allocation3 + $0x1], 0 }
   0x2   :  { %11 = vsyncpa [#allocation4], 0 }
   0x3   :  { %13 = vsyncpa [#allocation4 + $0x1], 0  ;;  %s612_s12 = smov 0   ;;  %s614_s13 = smov 0  }
   0x4   :  { %s616_s14 = smov 0   ;;  %s618_s15 = smov 0  }
   0x5   :  { %s620_s16 = smov 0   ;;  %s622_s17 = smov 0  }
   0x6 LB: > { %s387_s18 = sadd.s32 4294967295, %s586_s17   ;;  %s388_s19 = sadd.s32 4294967294, %s586_s17   ;;  %s586_s17 = sphi %s622_s17, %s19_s17   ;;  %s582_s16 = sphi %s620_s16, %s817_s16   ;;  %s578_s15 = sphi %s618_s15, %s816_s15   ;;  %s574_s14 = sphi %s616_s14, %s815_s14   ;;  %s570_s13 = sphi %s614_s13, %s814_s13   ;;  %s566_s12 = sphi %s612_s12, %s813_s12  }
   0x7   : > { %s31_s20 = sadd.s32 1, %s582_s16  ;;  %s40_s21 = sadd.s32 1, %s574_s14 }
   0x8   : > { %p33_p0 = scmp.ge.s32.totalorder %s31_s20, 2  ;;  %p47_p1 = scmp.ne.s32.totalorder %s574_s14, %s570_s13 }
   0x9   : > { %p48_p2 = scmp.eq.s32.totalorder %s586_s17, 0  ;;  %p53_p3 = scmp.ne.s32.totalorder %s570_s13, %s566_s12 }
   0xa   : > { %s819_s20 = smov (%p33_p0, %s31_s20), 0  ;;  %p54_p5 = scmp.eq.s32.totalorder %s387_s18, 0 }
   0xb   : > { %p653_p4 = por %p48_p2, %p47_p1  ;;  %s35_s23 = ssub.s32 %s582_s16, %s819_s20 }
   0xc   : > { %p121_p6 = scmp.eq.s32.totalorder %s387_s18, 1  ;;  %p38_p7 = scmp.eq.s32.totalorder %s35_s23, 0 }
   0xd   : > { %p659_p8 = por %p54_p5, %p53_p3  ;;  %p127_p10 = scmp.eq.s32.totalorder %s388_s19, 1 }
   0xe   : > { %p663_p9 = por %p121_p6, %p47_p1  ;;  %p416_p13 = scmp.lt.s32.totalorder %s586_s17, 2 }
   0xf   : > { %s668_s26 = scalar_select %p38_p7, %s574_s14, %s40_s21  }
  0x10   : > { %s805_s25 = scalar_select %p663_p9, 1, 0 }
  0x11   : > { %p670_p11 = por %p127_p10, %p53_p3  ;;  %s153_s28 = sand.u32 1, %s574_s14  }
  0x12   : > { %s391_s29 = sshll.u32 %s153_s28, 3  ;;  %s402_s30 = sshll.u32 %s582_s16, 7 }
  0x13   : > { %s806_s27 = scalar_select %p670_p11, 1, 0 }
  0x14   : > { %s681_s6 = scalar_lea.hbm %s798_s0, %s402_s30  ;;  %s157_s7 = scalar_lea.vmem [#allocation2], %s391_s29 }
  0x15   : > { %s167_s8 = sshll.u32 %s157_s7, 4  ;;  %p687_p0 = pnand %p416_p13, %p653_p4  ;;  %s683_s8 = int_to_ptr.vmem [resolvable:$true] %s167_s8 }
  0x16   : > { %s154_s10 = scalar_lea.sflag [#allocation3], %s153_s28  ;;  %s474_s11 = scalar_lea.hbm %s681_s6, 128 }
  0x17   : > { %p475_p3 = scmp.ne.s32.totalorder %s681_s6, %s474_s11  ;;  %p476_p5 = pneg %p687_p0 }
  0x18   : > { %s479_s21 = scalar_lea.hbm %s798_s0, 256  ;;  %p480_p4 = scmp.lt.u32.totalorder %s681_s6, %s798_s0 }
  0x19   : > { %p477_p6 = pnand %p476_p5, %p475_p3  ;;  %p481_p10 = scmp.lt.u32.totalorder %s479_s21, %s474_s11 }
  0x1a   : > { %p483_p12 = scmp.lt.u32.totalorder %s474_s11, %s681_s6 }
  0x1b   : > { %p478_p7 = pneg %p477_p6  ;;  %p482_p13 = por %p481_p10, %p480_p4 }
  0x1d   : > { %p484_p1 = por %p483_p12, %p482_p13 }
  0x1f   : > { %p485_p2 = pnand %p484_p1, %p478_p7 }
  0x21   : > { %488 = shalt.err (!%p485_p2)
}
  0x22   : > { %s489_s28 = scalar_lea.vmem %s683_s8, 128  ;;  %s588_s29 = smov [#allocation2]  }
  0x23   : > { %p490_p3 = scmp.ne.s32.totalorder %s683_s8, %s489_s28  ;;  %s494_s30 = sshll.u32 %s588_s29, 4  ;;  %s495_s30 = int_to_ptr.vmem [resolvable:$false] %s494_s30 }
  0x24   : > { %s496_s4 = scalar_lea.vmem %s495_s30, 256  ;;  %p497_p9 = scmp.lt.s32.totalorder %s683_s8, %s495_s30 }
  0x25   : > { %p492_p6 = pnand %p490_p3, %p476_p5  ;;  %p498_p4 = scmp.lt.s32.totalorder %s496_s4, %s489_s28 }
  0x27   : > { %p493_p11 = pneg %p492_p6  ;;  %p499_p10 = por %p498_p4, %p497_p9 }
  0x29   : > { %p500_p12 = pnand %p499_p10, %p493_p11 }
  0x2b   : > { %503 = shalt.err (!%p500_p12)
}
  0x2c   : > { %411 = dma.hbm_to_vmem [thread:$0]  (!%p687_p0), %s681_s6, 128, %s683_s8, %s154_s10  }
  0x2d   : > { %p808_p1 = scmp.lt.s32.totalorder %s586_s17, 3  ;;  %p809_p2 = scmp.ge.s32.totalorder %s586_s17, 1 }
  0x2f   : > { %p173_p5 = pnand %p809_p2, %p808_p1 }
  0x30   : > { %s723_s5 = sand.u32 (!%p173_p5), 1, %s570_s13  }
  0x31   : > { %176 = sbr.rel (%p173_p5) target bundleno = 209 (0xd1), region = 32  ;;  %s395_s7 = sshll.u32 (!%p173_p5), %s723_s5, 3 }
  0x32   : > { %s179_s11 = scalar_lea.sflag (!%p173_p5), [#allocation3], %s723_s5  ;;  %s182_s9 = scalar_lea.vmem (!%p173_p5), [#allocation2], %s395_s7 }
  0x38   : > { %557 = dma.done.wait (%p659_p8), %s179_s11, 128  }
  0x39   : > { %559 = vsyncadd (%p659_p8), %s179_s11, 4294967168  ;;  %v589_v0 = vmov 0   ;;  %v258_v1 = vld [vmem:[%s799_s1] sm:$0xf]  ;;  %vm211_vm0 = vcmask 1043456   ;;  %v279_v45 = vlaneseq  ;;  %s403_s24 = sshll.u32 %s578_s15, 7 }
  0x3a   : > { %468 = vset.pattern.permute.xlu0 %v589_v0  ;;  %v259_v2 = vld [vmem:[%s800_s2] sm:$0xf]  ;;  %v590_v43 = vmov 839922192   ;;  %s204_s19 = scalar_lea.vmem [#allocation5], %s395_s7  ;;  %s749_s28 = scalar_lea.hbm %s801_s3, %s403_s24 }
  0x3b   : > { %262 = vperm.xlu0 %468, %v258_v1   ;;  %v207_v3 = vld [vmem:[%s182_s9] sm:$0xff]  ;;  %v277_v44 = vunpack.c.l.s4 %v590_v43  ;;  %v280_v48 = vshrl.u32 %v279_v45, 7  ;;  %s303_s21 = sshll.u32 %s204_s19, 4  ;;  %s287_s29 = scalar_lea.sflag [#allocation4], %s723_s5  ;;  %s751_s21 = int_to_ptr.vmem [resolvable:$true] %s303_s21 }
  0x3c   : > { %v209_v4 = vcombine.high %v207_v3, %v207_v3  ;;  %v212_v5 = vsel %vm211_vm0, %v207_v3, 0.0  ;;  %s504_s30 = scalar_lea.vmem %s751_s21, 128  ;;  %p810_p9 = scmp.ne.s32.totalorder %s805_s25, 0 }
  0x3d   : > { %v213_v7 = vrot.slane %v212_v5, 4  ;;  %v278_v47 = vunpack.c.0.s8 %v277_v44  ;;  %p505_p8 = scmp.ne.s32.totalorder %s751_s21, %s504_s30  ;;  %s591_s15 = smov [#allocation5]  }
  0x3e   : > { %v219_v6 = vsel %vm211_vm0, %v209_v4, 0.0  ;;  %s508_s4 = sshll.u32 %s591_s15, 4  ;;  %s509_s4 = int_to_ptr.vmem [resolvable:$false] %s508_s4 }
  0x3f   : > { %274 = vperm.xlu0 %468, %v259_v2   ;;  %v220_v8 = vrot.slane %v219_v6, 4  ;;  %v214_v9 = vadd.f32 %v213_v7, %v212_v5  ;;  %v281_v53 = vsub.s32 %v278_v47, %v280_v48  ;;  %p506_p11 = pnand %p505_p8, %p810_p9  ;;  %s510_s7 = scalar_lea.vmem %s509_s4, 256 }
  0x40   : > { %p511_p7 = scmp.lt.s32.totalorder %s751_s21, %s509_s4  ;;  %p512_p13 = scmp.lt.s32.totalorder %s510_s7, %s504_s30 }
  0x41   : > { %v221_v10 = vadd.f32 %v220_v8, %v219_v6  ;;  %v215_v11 = vrot.slane %v214_v9, 2  ;;  %p507_p0 = pneg %p506_p11 }
  0x42   : > { %p513_p3 = por %p512_p13, %p511_p7 }
  0x43   : > { %v222_v12 = vrot.slane %v221_v10, 2  ;;  %v216_v13 = vadd.f32 %v215_v11, %v214_v9 }
  0x44   : > { %p514_p6 = pnand %p513_p3, %p507_p0 }
  0x45   : > { %v223_v14 = vadd.f32 %v222_v12, %v221_v10  ;;  %v217_v15 = vrot.slane %v216_v13, 1 }
  0x47   : > { %v224_v16 = vrot.slane %v223_v14, 1  ;;  %v218_v17 = vadd.f32 %v217_v15, %v216_v13 }
  0x49   : > { %v225_v18 = vadd.f32 %v224_v16, %v223_v14  ;;  %v227_v19 = vmul.f32 0.25, %v218_v17 }
  0x4b   : > { %v228_v20 = vmul.f32 0.25, %v225_v18 }
  0x4d   : > { %v231_v21 = vcombine.low %v227_v19, %v228_v20 }
  0x4f   : > { %v233_v22 = vsub.f32 %v207_v3, %v231_v21 }
  0x51   : > { %v234_v23 = vmul.f32 %v233_v22, %v233_v22 }
  0x53   : > { %v236_v24 = vcombine.high %v234_v23, %v234_v23  ;;  %v238_v25 = vsel %vm211_vm0, %v234_v23, 0.0 }
  0x54   : > { %v239_v27 = vrot.slane %v238_v25, 4 }
  0x55   : > { %v245_v26 = vsel %vm211_vm0, %v236_v24, 0.0 }
  0x56   : > { %v246_v28 = vrot.slane %v245_v26, 4  ;;  %v240_v29 = vadd.f32 %v239_v27, %v238_v25 }
  0x58   : > { %v247_v30 = vadd.f32 %v246_v28, %v245_v26  ;;  %v241_v31 = vrot.slane %v240_v29, 2 }
  0x5a   : > { %v248_v32 = vrot.slane %v247_v30, 2  ;;  %v242_v33 = vadd.f32 %v241_v31, %v240_v29 }
  0x5c   : > { %v249_v34 = vadd.f32 %v248_v32, %v247_v30  ;;  %v243_v35 = vrot.slane %v242_v33, 1 }
  0x5e   : > { %v250_v36 = vrot.slane %v249_v34, 1  ;;  %v244_v37 = vadd.f32 %v243_v35, %v242_v33 }
  0x60   : > { %v251_v38 = vadd.f32 %v250_v36, %v249_v34  ;;  %v252_v39 = vmul.f32 0.25, %v244_v37 }
  0x62   : > { %v253_v40 = vmul.f32 0.25, %v251_v38  ;;  %v254_v41 = vadd.f32 1e-05, %v252_v39 }
  0x64   : > { %v255_v42 = vadd.f32 1e-05, %v253_v40  ;;  %470 = vrsqrt.f32 %v254_v41 }
  0x66   : > { %472 = vrsqrt.f32 %v255_v42 }
  0x6e   : > { %v471_v46 = vpop.eup %470 }
  0x70   : > { %v473_v49 = vpop.eup %472 }
  0xba   : > { %v263_v50 = vpop.permute.xlu0 %262 }
  0xbb   : > { %v265_v51 = vmul.f32 %v471_v46, %v263_v50  ;;  %v266_v52 = vmul.f32 %v473_v49, %v263_v50 }
  0xbd   : > { %v269_v54 = vcombine.low %v265_v51, %v266_v52 }
  0xbe   : > { %v275_v55 = vpop.permute.xlu0 %274 }
  0xbf   : > { %v271_v56 = vmul.f32 %v269_v54, %v233_v22  ;;  %v282_v57 = vrot.slane %v275_v55, %v281_v53 }
  0xc1   : > { %v284_v58 = vadd.f32 %v282_v57, %v271_v56 }
  0xc3   : > { %285 = vst [vmem:[%s204_s19] sm:$0xff] %v284_v58 }
  0xc4   : > { %517 = shalt.err (!%p514_p6)
}
  0xc5   : > { %s518_s5 = scalar_lea.hbm %s749_s28, 128  ;;  %s522_s6 = scalar_lea.hbm %s801_s3, 256 }
  0xc6   : > { %p519_p4 = scmp.ne.s32.totalorder %s749_s28, %s518_s5  ;;  %p523_p1 = scmp.lt.u32.totalorder %s749_s28, %s801_s3 }
  0xc7   : > { %p524_p2 = scmp.lt.u32.totalorder %s522_s6, %s518_s5  ;;  %p526_p8 = scmp.lt.u32.totalorder %s518_s5, %s749_s28 }
  0xc8   : > { %p520_p10 = pnand %p519_p4, %p810_p9 }
  0xc9   : > { %p525_p5 = por %p524_p2, %p523_p1 }
  0xca   : > { %p521_p12 = pneg %p520_p10 }
  0xcb   : > { %p527_p11 = por %p526_p8, %p525_p5 }
  0xcd   : > { %p528_p0 = pnand %p527_p11, %p521_p12 }
  0xcf   : > { %531 = shalt.err (!%p528_p0)
}
  0xd0   : > { %406 = dma.vmem_to_hbm [thread:$0]  (%p810_p9), %s751_s21, 128, %s749_s28, %s287_s29  }
  0xd1 PF: > { %s315_s18 = sand.u32 1, %s566_s12   ;;  %p811_p7 = scmp.ne.s32.totalorder %s806_s27, 0 }
  0xd2   : > { %p812_p13 = scmp.ge.s32.totalorder %s586_s17, 2  ;;  %s316_s24 = scalar_lea.sflag [#allocation4], %s315_s18 }
  0xd4   : > { %p413_p3 = pnand %p812_p13, %p811_p7 }
  0xd6   : > { %561 = dma.done.wait (!%p413_p3), %s316_s24, 128  }
  0xd7   : > { %563 = vsyncadd (!%p413_p3), %s316_s24, 4294967168  ;;  %s19_s17 = sadd.s32 1, %s586_s17   ;;  %s813_s12 = smov %s570_s13 }
  0xd8   : > { %p16_p6 = scmp.ge.s32.totalorder %s19_s17, 4   ;;  %s814_s13 = smov %s574_s14 }
  0xd9   : > { %s815_s14 = smov %s668_s26  ;;  %s816_s15 = smov %s582_s16 }
  0xda   : > { %s817_s16 = smov %s819_s20  ;;  %18 = sbr.rel (!%p16_p6) target bundleno = 6 (0x6), region = 77 }
  0xe1   :  { %321 = vsyncpa [#allocation3], 1 }
  0xe2   :  { %323 = vsyncpa [#allocation3 + $0x1], 1 }
  0xe3   :  { %324 = vsyncpa [#allocation4], 1 }
  0xe4   :  { %326 = vsyncpa [#allocation4 + $0x1], 1 }

</bundles_post_ra>
